<compile_context>
chip_gen: v7x
topology: tpu7x:2x2x1
jax: 0.10.0
libtpu: 0.0.40
codegen_flags: <defaults>
</compile_context>

<pallas_src>
import jax
import jax.numpy as jnp
from jax.experimental import pallas as pl
from jax.experimental.pallas import tpu as pltpu


def _round_up(x, m):
    return ((x + m - 1) // m) * m


def _stochastic_decoder_kernel(z_ref, w1_ref, b1_ref, w2_ref, b2_ref, w3_ref, b3_ref,
                               out_ref):
    # z_ref: (TB, z_dim)  w1: (z_dim, PH)  w2: (PH, PH)  w3: (PH, x_dim)
    # b1/b2: (1, PH)      b3: (1, x_dim)   out_ref: (TB, x_dim)
    # Hidden layer 1: Linear + ReLU (MXU matmul, f32 accumulate; bias/ReLU on VPU).
    h = jnp.dot(z_ref[...], w1_ref[...], preferred_element_type=jnp.float32) + b1_ref[...]
    h = jnp.maximum(h, 0.0)
    # Hidden layer 2: Linear + ReLU.
    h = jnp.dot(h, w2_ref[...], preferred_element_type=jnp.float32) + b2_ref[...]
    h = jnp.maximum(h, 0.0)
    # dense_logits: Linear, no output activation (output_act=None).
    o = jnp.dot(h, w3_ref[...], preferred_element_type=jnp.float32) + b3_ref[...]
    out_ref[...] = o.astype(out_ref.dtype)


def pack_params(params):
    """Pad/pack the Linear params ONCE (hoisted out of the per-call forward path).

    params: [(W1,b1),(W2,b2),(W3,b3)] with W:(in,out), b:(1,out).
    Hidden widths are zero-padded to a common 128-lane multiple PH; padded lanes stay
    exactly zero through ReLU, and padded W rows are zero, so results are unchanged.
    """
    (w1, b1), (w2, b2), (w3, b3) = params
    z_dim, h1 = w1.shape
    h2 = w2.shape[1]
    x_dim = w3.shape[1]
    PH = _round_up(max(h1, h2), 128)

    w1_p = jnp.pad(w1, ((0, 0), (0, PH - h1)))                      # (z_dim, PH)
    b1_p = jnp.pad(b1.reshape(1, -1), ((0, 0), (0, PH - h1)))       # (1, PH)
    w2_p = jnp.pad(w2, ((0, PH - h1), (0, PH - h2)))                # (PH, PH)
    b2_p = jnp.pad(b2.reshape(1, -1), ((0, 0), (0, PH - h2)))       # (1, PH)
    w3_p = jnp.pad(w3, ((0, PH - h2), (0, 0)))                      # (PH, x_dim)
    b3_p = b3.reshape(1, -1)                                        # (1, x_dim)
    return (w1_p, b1_p, w2_p, b2_p, w3_p, b3_p)


def _choose_batch_tile(B, tile_cap):
    """8-aligned batch tile, balanced across tiles to minimize last-tile waste."""
    cap = max(8, (int(tile_cap) // 8) * 8)
    b8 = _round_up(B, 8)
    if b8 <= cap:
        return b8                                   # single tile, <=7 wasted rows
    n_tiles = -(-b8 // cap)                         # minimum #tiles at this cap
    return _round_up(-(-B // n_tiles), 8)           # balanced, 8-aligned


def stochastic_decoder_forward(z, packed_params, *, tile_b=1024):
    """z: (B, z_dim) f32; packed_params: output of pack_params()."""
    w1_p, b1_p, w2_p, b2_p, w3_p, b3_p = packed_params
    B, z_dim = z.shape
    PH = w2_p.shape[0]
    x_dim = w3_p.shape[1]

    TB = _choose_batch_tile(B, tile_b)
    B_pad = -(-B // TB) * TB
    z_p = z if B_pad == B else jnp.pad(z, ((0, B_pad - B), (0, 0)))

    out = pl.pallas_call(
        _stochastic_decoder_kernel,
        out_shape=jax.ShapeDtypeStruct((B_pad, x_dim), z.dtype),
        grid=(B_pad // TB,),
        in_specs=[
            pl.BlockSpec((TB, z_dim), lambda i: (i, 0)),   # unpadded z, batch-tiled
            pl.BlockSpec((z_dim, PH), lambda i: (0, 0)),   # weights/biases: constant
            pl.BlockSpec((1, PH), lambda i: (0, 0)),       # index_map -> VMEM-resident,
            pl.BlockSpec((PH, PH), lambda i: (0, 0)),      # DMA'd once per call.
            pl.BlockSpec((1, PH), lambda i: (0, 0)),
            pl.BlockSpec((PH, x_dim), lambda i: (0, 0)),
            pl.BlockSpec((1, x_dim), lambda i: (0, 0)),
        ],
        out_specs=pl.BlockSpec((TB, x_dim), lambda i: (i, 0)),   # true-width output
        compiler_params=pltpu.CompilerParams(
            dimension_semantics=("parallel",),   # batch tiles independent (megacore)
        ),
    )(z_p, w1_p, b1_p, w2_p, b2_p, w3_p, b3_p)

    return out if B_pad == B else out[:B]


def init_params(key, z_dim, hidden_dims, x_dim):
    """Deterministic init mimicking torch.nn.Linear default (uniform +-1/sqrt(fan_in))."""
    dims = [z_dim] + list(hidden_dims) + [x_dim]
    params = []
    for d_in, d_out in zip(dims[:-1], dims[1:]):
        key, kw, kb = jax.random.split(key, 3)
        bound = 1.0 / jnp.sqrt(jnp.float32(d_in))
        w = jax.random.uniform(kw, (d_in, d_out), jnp.float32, -bound, bound)
        b = jax.random.uniform(kb, (1, d_out), jnp.float32, -bound, bound)
        params.append((w, b))
    return params


def reference_forward(z, params):
    (w1, b1), (w2, b2), (w3, b3) = params
    h = jnp.maximum(z @ w1 + b1, 0.0)
    h = jnp.maximum(h @ w2 + b2, 0.0)
    return h @ w3 + b3


if __name__ == "__main__":
    # Shapes consistent with the module: z_dim=16, hidden_dims=[32, 32], x_dim=64.
    z_dim, hidden_dims, x_dim = 16, [32, 32], 64

    key = jax.random.PRNGKey(0)
    key, kz1, kz2 = jax.random.split(key, 3)
    params = init_params(key, z_dim, hidden_dims, x_dim)

    # Pack/pad weights ONCE (not per forward call).
    packed = jax.tree_util.tree_map(jax.block_until_ready, pack_params(params))

    fwd = jax.jit(stochastic_decoder_forward)

    # Small-batch check (single 8-row tile).
    z_small = jax.random.normal(kz1, (8, z_dim), dtype=jnp.float32)
    out_small = jax.block_until_ready(fwd(z_small, packed))
    ref_small = reference_forward(z_small, params)
    assert out_small.shape == (8, x_dim)
    assert jnp.allclose(out_small, ref_small, atol=2e-5, rtol=1e-5)

    # Non-multiple-of-8 batch: exercises adaptive tiling + batch edge padding.
    z_big = jax.random.normal(kz2, (300, z_dim), dtype=jnp.float32)
    out_big = jax.block_until_ready(fwd(z_big, packed))
    ref_big = reference_forward(z_big, params)
    assert out_big.shape == (300, x_dim)
    assert jnp.allclose(out_big, ref_big, atol=2e-5, rtol=1e-5)

    # Multi-tile check (several batch tiles through the pipelined grid).
    key, kz3 = jax.random.split(key)
    z_multi = jax.random.normal(kz3, (2304, z_dim), dtype=jnp.float32)
    out_multi = jax.block_until_ready(fwd(z_multi, packed))
    ref_multi = reference_forward(z_multi, params)
    assert out_multi.shape == (2304, x_dim)
    assert jnp.allclose(out_multi, ref_multi, atol=2e-5, rtol=1e-5)

    print("KERNEL_OK")
</pallas_src>

<mosaic_0001>
module attributes {stable_mosaic.version = 11 : i64} {
  func.func @_stochastic_decoder_kernel(%arg0: i32, %arg1: memref<8x16xf32, #tpu.memory_space<vmem>>, %arg2: memref<16x128xf32, #tpu.memory_space<vmem>>, %arg3: memref<1x128xf32, #tpu.memory_space<vmem>>, %arg4: memref<128x128xf32, #tpu.memory_space<vmem>>, %arg5: memref<1x128xf32, #tpu.memory_space<vmem>>, %arg6: memref<128x64xf32, #tpu.memory_space<vmem>>, %arg7: memref<1x64xf32, #tpu.memory_space<vmem>>, %arg8: memref<8x64xf32, #tpu.memory_space<vmem>>) attributes {dimension_semantics = [#tpu.dimension_semantics<parallel>], iteration_bounds = array<i64: 1>, scalar_prefetch = 0 : i64, scratch_operands = 0 : i64, tpu.core_type = #tpu.core_type<tc>, window_params = [{transform_indices = @transform_0, window_bounds = array<i64: 8, 16>}, {pipeline_mode = #tpu.pipeline_mode<synchronous>, transform_indices = @transform_1, window_bounds = array<i64: 16, 128>}, {pipeline_mode = #tpu.pipeline_mode<synchronous>, transform_indices = @transform_2, window_bounds = array<i64: 1, 128>}, {pipeline_mode = #tpu.pipeline_mode<synchronous>, transform_indices = @transform_3, window_bounds = array<i64: 128, 128>}, {pipeline_mode = #tpu.pipeline_mode<synchronous>, transform_indices = @transform_4, window_bounds = array<i64: 1, 128>}, {pipeline_mode = #tpu.pipeline_mode<synchronous>, transform_indices = @transform_5, window_bounds = array<i64: 128, 64>}, {pipeline_mode = #tpu.pipeline_mode<synchronous>, transform_indices = @transform_6, window_bounds = array<i64: 1, 64>}, {transform_indices = @transform_7, window_bounds = array<i64: 8, 64>}]} {
    %c0 = arith.constant 0 : index
    %c0_0 = arith.constant 0 : index
    %0 = vector.load %arg1[%c0, %c0_0] : memref<8x16xf32, #tpu.memory_space<vmem>>, vector<8x16xf32>
    %c0_1 = arith.constant 0 : index
    %c0_2 = arith.constant 0 : index
    %1 = vector.load %arg2[%c0_1, %c0_2] : memref<16x128xf32, #tpu.memory_space<vmem>>, vector<16x128xf32>
    %cst = arith.constant dense<0.000000e+00> : vector<8x128xf32>
    %2 = tpu.matmul %0, %1, %cst {dimension_numbers = #tpu.dot_dimension_numbers<[1], [0], [0], [1], [0, 0, 1, 1], [], []>} : vector<8x16xf32>, vector<16x128xf32>, vector<8x128xf32> -> vector<8x128xf32>
    %c0_3 = arith.constant 0 : index
    %c0_4 = arith.constant 0 : index
    %3 = vector.load %arg3[%c0_3, %c0_4] : memref<1x128xf32, #tpu.memory_space<vmem>>, vector<1x128xf32>
    %4 = vector.broadcast %3 : vector<1x128xf32> to vector<8x128xf32>
    %5 = arith.addf %2, %4 : vector<8x128xf32>
    %cst_5 = arith.constant 0.000000e+00 : f32
    %6 = vector.broadcast %cst_5 : f32 to vector<8x128xf32>
    %7 = arith.maximumf %5, %6 : vector<8x128xf32>
    %c0_6 = arith.constant 0 : index
    %c0_7 = arith.constant 0 : index
    %8 = vector.load %arg4[%c0_6, %c0_7] : memref<128x128xf32, #tpu.memory_space<vmem>>, vector<128x128xf32>
    %cst_8 = arith.constant dense<0.000000e+00> : vector<8x128xf32>
    %9 = tpu.matmul %7, %8, %cst_8 {dimension_numbers = #tpu.dot_dimension_numbers<[1], [0], [0], [1], [0, 0, 1, 1], [], []>} : vector<8x128xf32>, vector<128x128xf32>, vector<8x128xf32> -> vector<8x128xf32>
    %c0_9 = arith.constant 0 : index
    %c0_10 = arith.constant 0 : index
    %10 = vector.load %arg5[%c0_9, %c0_10] : memref<1x128xf32, #tpu.memory_space<vmem>>, vector<1x128xf32>
    %11 = vector.broadcast %10 : vector<1x128xf32> to vector<8x128xf32>
    %12 = arith.addf %9, %11 : vector<8x128xf32>
    %cst_11 = arith.constant 0.000000e+00 : f32
    %13 = vector.broadcast %cst_11 : f32 to vector<8x128xf32>
    %14 = arith.maximumf %12, %13 : vector<8x128xf32>
    %c0_12 = arith.constant 0 : index
    %c0_13 = arith.constant 0 : index
    %15 = vector.load %arg6[%c0_12, %c0_13] : memref<128x64xf32, #tpu.memory_space<vmem>>, vector<128x64xf32>
    %cst_14 = arith.constant dense<0.000000e+00> : vector<8x64xf32>
    %16 = tpu.matmul %14, %15, %cst_14 {dimension_numbers = #tpu.dot_dimension_numbers<[1], [0], [0], [1], [0, 0, 1, 1], [], []>} : vector<8x128xf32>, vector<128x64xf32>, vector<8x64xf32> -> vector<8x64xf32>
    %c0_15 = arith.constant 0 : index
    %c0_16 = arith.constant 0 : index
    %17 = vector.load %arg7[%c0_15, %c0_16] : memref<1x64xf32, #tpu.memory_space<vmem>>, vector<1x64xf32>
    %18 = vector.broadcast %17 : vector<1x64xf32> to vector<8x64xf32>
    %19 = arith.addf %16, %18 : vector<8x64xf32>
    %c0_17 = arith.constant 0 : index
    %c0_18 = arith.constant 0 : index
    %20 = vector.load %arg8[%c0_17, %c0_18] : memref<8x64xf32, #tpu.memory_space<vmem>>, vector<8x64xf32>
    tpu.vector_store %arg8[%c0_17, %c0_18], %19 {strides = array<i32>} : memref<8x64xf32, #tpu.memory_space<vmem>>, vector<8x64xf32>,
    return
  }
  func.func @transform_0(%arg0: i32) -> (i32, i32) {
    %c0_i32 = arith.constant 0 : i32
    %c0_i32_0 = arith.constant 0 : i32
    return %arg0, %c0_i32 : i32, i32
  }
  func.func @transform_1(%arg0: i32) -> (i32, i32) {
    %c0_i32 = arith.constant 0 : i32
    %c0_i32_0 = arith.constant 0 : i32
    %c0_i32_1 = arith.constant 0 : i32
    return %c0_i32, %c0_i32_0 : i32, i32
  }
  func.func @transform_2(%arg0: i32) -> (i32, i32) {
    %c0_i32 = arith.constant 0 : i32
    %c0_i32_0 = arith.constant 0 : i32
    %c0_i32_1 = arith.constant 0 : i32
    return %c0_i32, %c0_i32_0 : i32, i32
  }
  func.func @transform_3(%arg0: i32) -> (i32, i32) {
    %c0_i32 = arith.constant 0 : i32
    %c0_i32_0 = arith.constant 0 : i32
    %c0_i32_1 = arith.constant 0 : i32
    return %c0_i32, %c0_i32_0 : i32, i32
  }
  func.func @transform_4(%arg0: i32) -> (i32, i32) {
    %c0_i32 = arith.constant 0 : i32
    %c0_i32_0 = arith.constant 0 : i32
    %c0_i32_1 = arith.constant 0 : i32
    return %c0_i32, %c0_i32_0 : i32, i32
  }
  func.func @transform_5(%arg0: i32) -> (i32, i32) {
    %c0_i32 = arith.constant 0 : i32
    %c0_i32_0 = arith.constant 0 : i32
    %c0_i32_1 = arith.constant 0 : i32
    return %c0_i32, %c0_i32_0 : i32, i32
  }
  func.func @transform_6(%arg0: i32) -> (i32, i32) {
    %c0_i32 = arith.constant 0 : i32
    %c0_i32_0 = arith.constant 0 : i32
    %c0_i32_1 = arith.constant 0 : i32
    return %c0_i32, %c0_i32_0 : i32, i32
  }
  func.func @transform_7(%arg0: i32) -> (i32, i32) {
    %c0_i32 = arith.constant 0 : i32
    %c0_i32_0 = arith.constant 0 : i32
    return %arg0, %c0_i32 : i32, i32
  }
}

</mosaic_0001>

<bundles_post_ra>
// kernel: stochastic_decoder_forward.1
= control target key start
LH: loop header
LB: loop body
LE: loop exit
PB: predicated region body
PF: predicated region fallthrough
CT: control target
= control target key end

     0   :  { %v512_v2 = vmov 0.0|0.0   ;;  %vm513_vm0 = vmmov 0   ;;  %v514_v4 = vmov 0.0   ;;  %vm37_vm1 = vcmask 130048   ;;  %s702_s0 = inlined_call_operand.vmem [shape: f32[8,16], index: 0, kind: input, shape index: {}]   ;;  %s703_s1 = inlined_call_operand.vmem [shape: f32[16,128], index: 1, kind: input, shape index: {}]   ;;  %s704_s2 = inlined_call_operand.vmem [shape: f32[1,128], index: 2, kind: input, shape index: {}]   ;;  %s705_s3 = inlined_call_operand.vmem [shape: f32[128,128], index: 3, kind: input, shape index: {}]   ;;  %s706_s4 = inlined_call_operand.vmem [shape: f32[1,128], index: 4, kind: input, shape index: {}]   ;;  %s707_s5 = inlined_call_operand.vmem [shape: f32[128,64], index: 5, kind: input, shape index: {}]   ;;  %s708_s6 = inlined_call_operand.vmem [shape: f32[1,64], index: 6, kind: input, shape index: {}]   ;;  %s709_s7 = inlined_call_operand.hbm [shape: f32[8,64], index: 7, kind: output, shape index: {}]  }
   0x1   :  { %v28_v0 = vld [vmem:[%s703_s1] sm:$0xff]  ;;  %v29_v1 = vld [vmem:[%s703_s1 + $0x8] sm:$0xff]  ;;  %433 = vmatprep.subr.bf16.mxu0 %v512_v2  ;;  %360 = vmatprep.mubr.msk.f32.mxu0 %vm513_vm0, %v514_v4  ;;  %v114_v7 = vld [vmem:[%s705_s3 + $0x10] sm:$0xff] }
   0x2   :  { %v434_v3 = vpack.c.bf16 %v29_v1, %v28_v0  ;;  %v112_v5 = vld [vmem:[%s705_s3] sm:$0xff]  ;;  %v113_v6 = vld [vmem:[%s705_s3 + $0x8] sm:$0xff]  ;;  %436 = vmatprep.subr.bf16.mxu1 %v512_v2  ;;  %v115_v9 = vld [vmem:[%s705_s3 + $0x18] sm:$0xff]  ;;  %395 = vmatprep.mubr.msk.f32.mxu1 %vm513_vm0, %v514_v4 }
   0x3   :  { %v437_v8 = vpack.c.bf16 %v113_v6, %v112_v5  ;;  %v27_v10 = vld [vmem:[%s702_s0] sm:$0xff]  ;;  %v440_v11 = vpack.c.bf16 %v115_v9, %v114_v7  ;;  %v117_v13 = vld [vmem:[%s705_s3 + $0x28] sm:$0xff] }
   0x4   :  { %435 = vmatpush3.bf16.msra.mxu0 %v434_v3  ;;  %v116_v12 = vld [vmem:[%s705_s3 + $0x20] sm:$0xff] }
   0x5   :  { %438 = vmatpush3.bf16.msra.mxu1 %v437_v8  ;;  %460 = vmatprep.subr.bf16.mxu0 %v512_v2 }
   0x6   :  { %439 = vmatprep.subr.bf16.mxu1 %v512_v2 }
   0x7   :  { %361 = vmatmul.mubr.msk.f32.vlgmr.msra.gmra.mrb[0].mxu0 %vm37_vm1, %v27_v10 }
   0x8   :  { %12 = vsyncpa [#allocation3], 0  ;;  %430 = vmatprep.mubr.msk.f32.mxu0 %vm513_vm0, %v514_v4  ;;  %v443_v14 = vpack.c.bf16 %v117_v13, %v116_v12  ;;  %v118_v15 = vld [vmem:[%s705_s3 + $0x30] sm:$0xff]  ;;  %v119_v16 = vld [vmem:[%s705_s3 + $0x38] sm:$0xff]  ;;  %s515_s22 = smov [#allocation2]   ;;  %vm299_vm2 = vcmask 523264  }
   0x9   :  { %441 = vmatpush3.bf16.msra.mxu1 %v440_v11  ;;  %v446_v17 = vpack.c.bf16 %v119_v16, %v118_v15  ;;  %v120_v18 = vld [vmem:[%s705_s3 + $0x40] sm:$0xff]  ;;  %v121_v19 = vld [vmem:[%s705_s3 + $0x48] sm:$0xff]  ;;  %v122_v21 = vld [vmem:[%s705_s3 + $0x50] sm:$0xff]  ;;  %s307_s23 = sshll.u32 %s515_s22, 4  ;;  %s308_s23 = int_to_ptr.vmem [resolvable:$true] %s307_s23 }
   0xa   :  { %442 = vmatprep.subr.bf16.mxu1 %v512_v2  ;;  %v449_v20 = vpack.c.bf16 %v121_v19, %v120_v18  ;;  %v123_v22 = vld [vmem:[%s705_s3 + $0x58] sm:$0xff]  ;;  %v124_v24 = vld [vmem:[%s705_s3 + $0x60] sm:$0xff]  ;;  %v125_v25 = vld [vmem:[%s705_s3 + $0x68] sm:$0xff]  ;;  %p493_p1 = scmp.lt.s32.totalorder %s308_s23, %s308_s23 }
   0xb   :  { %v452_v23 = vpack.c.bf16 %v123_v22, %v122_v21  ;;  %v455_v26 = vpack.c.bf16 %v125_v25, %v124_v24  ;;  %v126_v27 = vld [vmem:[%s705_s3 + $0x70] sm:$0xff]  ;;  %v127_v28 = vld [vmem:[%s705_s3 + $0x78] sm:$0xff]  ;;  %v206_v30 = vld [vmem:[%s707_s5] sm:$0xff] }
   0xc   :  { %v458_v29 = vpack.c.bf16 %v127_v28, %v126_v27  ;;  %v207_v31 = vld [vmem:[%s707_s5 + $0x8] sm:$0xff]  ;;  %v208_v32 = vld [vmem:[%s707_s5 + $0x10] sm:$0xff]  ;;  %v209_v34 = vld [vmem:[%s707_s5 + $0x18] sm:$0xff] }
   0xd   :  { %444 = vmatpush3.bf16.msra.mxu1 %v443_v14  ;;  %v461_v33 = vpack.c.bf16 %v207_v31, %v206_v30  ;;  %v464_v35 = vpack.c.bf16 %v209_v34, %v208_v32  ;;  %v210_v36 = vld [vmem:[%s707_s5 + $0x20] sm:$0xff]  ;;  %v211_v37 = vld [vmem:[%s707_s5 + $0x28] sm:$0xff]  ;;  %v212_v39 = vld [vmem:[%s707_s5 + $0x30] sm:$0xff] }
   0xe   :  { %445 = vmatprep.subr.bf16.mxu1 %v512_v2  ;;  %v467_v38 = vpack.c.bf16 %v211_v37, %v210_v36  ;;  %v213_v40 = vld [vmem:[%s707_s5 + $0x38] sm:$0xff]  ;;  %v214_v42 = vld [vmem:[%s707_s5 + $0x40] sm:$0xff]  ;;  %v215_v43 = vld [vmem:[%s707_s5 + $0x48] sm:$0xff] }
   0xf   :  { %462 = vmatpush3.bf16.msra.mxu0 %v461_v33  ;;  %v470_v41 = vpack.c.bf16 %v213_v40, %v212_v39  ;;  %v473_v44 = vpack.c.bf16 %v215_v43, %v214_v42  ;;  %v216_v45 = vld [vmem:[%s707_s5 + $0x50] sm:$0xff]  ;;  %v217_v46 = vld [vmem:[%s707_s5 + $0x58] sm:$0xff]  ;;  %v218_v48 = vld [vmem:[%s707_s5 + $0x60] sm:$0xff] }
  0x10   :  { %463 = vmatprep.subr.bf16.mxu0 %v512_v2  ;;  %v476_v47 = vpack.c.bf16 %v217_v46, %v216_v45  ;;  %v219_v49 = vld [vmem:[%s707_s5 + $0x68] sm:$0xff]  ;;  %v315_v51 = vld [vmem:[%s704_s2] ss:$0 sm:$0xff]  ;;  %v220_v56 = vld [vmem:[%s707_s5 + $0x70] sm:$0xff] }
  0x11   :  { %447 = vmatpush3.bf16.msra.mxu1 %v446_v17  ;;  %v479_v50 = vpack.c.bf16 %v219_v49, %v218_v48  ;;  %v221_v57 = vld [vmem:[%s707_s5 + $0x78] sm:$0xff]  ;;  %v317_v59 = vld [vmem:[%s706_s4] ss:$0 sm:$0xff]  ;;  %s488_s5 = scalar_lea.vmem %s308_s23, 128 }
  0x12   :  { %448 = vmatprep.subr.bf16.mxu1 %v512_v2  ;;  %v482_v58 = vpack.c.bf16 %v221_v57, %v220_v56  ;;  %v318_v0 = vld [vmem:[%s708_s6] ss:$0 sm:$0xff]  ;;  %p489_p0 = scmp.ne.s32.totalorder %s308_s23, %s488_s5  ;;  %p494_p2 = scmp.lt.s32.totalorder %s488_s5, %s488_s5 }
  0x13   :  { %465 = vmatpush3.bf16.msra.mxu0 %v464_v35 }
  0x14   :  { %466 = vmatprep.subr.bf16.mxu0 %v512_v2  ;;  %p495_p3 = por %p494_p2, %p493_p1 }
  0x15   :  { %450 = vmatpush3.bf16.msra.mxu1 %v449_v20 }
  0x16   :  { %451 = vmatprep.subr.bf16.mxu1 %v512_v2  ;;  %p496_p4 = pnand %p495_p3, %p489_p0 }
  0x17   :  { %468 = vmatpush3.bf16.msra.mxu0 %v467_v38 }
  0x18   :  { %469 = vmatprep.subr.bf16.mxu0 %v512_v2 }
  0x19   :  { %453 = vmatpush3.bf16.msra.mxu1 %v452_v23 }
  0x1a   :  { %454 = vmatprep.subr.bf16.mxu1 %v512_v2 }
  0x1b   :  { %471 = vmatpush3.bf16.msra.mxu0 %v470_v41 }
  0x1c   :  { %472 = vmatprep.subr.bf16.mxu0 %v512_v2 }
  0x1d   :  { %456 = vmatpush3.bf16.msra.mxu1 %v455_v26 }
  0x1e   :  { %457 = vmatprep.subr.bf16.mxu1 %v512_v2 }
  0x1f   :  { %474 = vmatpush3.bf16.msra.mxu0 %v473_v44 }
  0x20   :  { %475 = vmatprep.subr.bf16.mxu0 %v512_v2 }
  0x21   :  { %459 = vmatpush3.bf16.msra.mxu1 %v458_v29 }
  0x23   :  { %477 = vmatpush3.bf16.msra.mxu0 %v476_v47 }
  0x24   :  { %478 = vmatprep.subr.bf16.mxu0 %v512_v2 }
  0x27   :  { %480 = vmatpush3.bf16.msra.mxu0 %v479_v50 }
  0x28   :  { %481 = vmatprep.subr.bf16.mxu0 %v512_v2 }
  0x2b   :  { %483 = vmatpush3.bf16.msra.mxu0 %v482_v58 }
  0xda   :  { %v107_v52 = vpop.f32.mrb[0].mxu0 }
  0xdb   :  { %v108_v53 = vadd.f32 %v315_v51, %v107_v52  ;;  %v362_v54 = vpop.f32.mrb[1].mxu0 }
  0xdd   :  { %v111_v55 = vmax.f32 %v108_v53, 0.0 }
  0xdf   :  { %396 = vmatmul.mubr.f32.vlgmr.msra.gmra.mrb[0].mxu1 %v111_v55 }
 0x1b2   :  { %v201_v60 = vpop.f32.mrb[0].mxu1 }
 0x1b3   :  { %v202_v61 = vadd.f32 %v317_v59, %v201_v60  ;;  %v397_v62 = vpop.f32.mrb[1].mxu1 }
 0x1b5   :  { %v205_v63 = vmax.f32 %v202_v61, 0.0 }
 0x1b7   :  { %431 = vmatmul.mubr.f32.vlgmr.msra.gmra.mrb[2].mxu0 %v205_v63 }
 0x28a   :  { %v295_v1 = vpop.f32.mrb[2].mxu0 }
 0x28b   :  { %v296_v2 = vadd.f32 %v318_v0, %v295_v1  ;;  %v432_v3 = vpop.f32.mrb[3].mxu0 }
 0x28d   :  { %300 = vst.msk [vmem:[#allocation2] sm:$0xff] %vm299_vm2, %v296_v2 }
 0x28e   :  { %499 = shalt.err (!%p496_p4)
}
 0x28f   :  { %s500_s25 = scalar_lea.hbm %s709_s7, 128 }
 0x290   :  { %p501_p5 = scmp.ne.s32.totalorder %s709_s7, %s500_s25  ;;  %p504_p6 = scmp.lt.u32.totalorder %s500_s25, %s709_s7 }
 0x292   :  { %p506_p7 = pnand %p504_p6, %p501_p5 }
 0x294   :  { %509 = shalt.err (!%p506_p7)
}
 0x295   :  { %310 = dma.vmem_to_hbm [thread:$0]  %s308_s23, 128, %s709_s7, [#allocation3]  }
 0x296   :  { %510 = dma.done.wait [#allocation3], 128  }
 0x297   :  { %511 = vsyncadd [#allocation3], 4294967168 }
 0x298   :  { %314 = vsyncpa [#allocation3], 1 }

</bundles_post_ra>
